<compile_context>
chip_gen: v7x
topology: tpu7x:2x2x1
jax: 0.10.0
libtpu: 0.0.40
codegen_flags: <defaults>
</compile_context>

<pallas_src>
import functools

import jax
import jax.numpy as jnp
from jax.experimental import pallas as pl
from jax.experimental.pallas import tpu as pltpu

EMB_DIM = 100
CONTEXT = 5
IN_FEAT = CONTEXT * EMB_DIM          # 500
IN_PAD = 512                         # 500 -> multiple of 128
HID = 100
HID_PAD = 128                        # 100 -> 128
NEG_BIG = -1e30                      # bias value for padded vocab lanes
MAX_TILE_V = 2048                    # lanes per w2 / output tile


def _cdiv(a, b):
    return -(-a // b)


def _round_up(n, m):
    return _cdiv(n, m) * m


def _v_layout(vocab_size):
    """Vocab tiling: tile_v (multiple of 128, <= MAX_TILE_V), nv tiles, padded V."""
    v_128 = _round_up(vocab_size, 128)
    nv = _cdiv(v_128, MAX_TILE_V)
    tile_v = _round_up(_cdiv(v_128, nv), 128)
    return tile_v, nv, tile_v * nv


def _b_layout(batch, tile_v):
    """Batch tiling: keep each (tile_b, tile_v) f32 output block <= ~2 MiB, pad < 1 tile."""
    cap = ((1 << 19) // tile_v) // 16 * 16      # tile_b * tile_v * 4B <= 2 MiB
    cap = max(16, min(1024, cap))
    nb = _cdiv(batch, cap)
    tile_b = _round_up(_cdiv(batch, nb), 16)    # 16-row aligned (bf16 sublane packing)
    return tile_b, nb, tile_b * nb


def _ff_kernel(x_ref, w1_ref, b1_ref, w2_ref, b2_ref,
               logits_ref, logp_ref, h_ref, m_ref, l_ref, *, nv):
    # x_ref:   (tile_b, 512)    bf16  flattened embeddings (zero-padded cols)
    # w1_ref:  (512, 128)       bf16  input_layer weight (transposed, zero-padded)
    # b1_ref:  (1, 128)         f32
    # w2_ref:  (128, tile_v)    bf16  output_layer weight tile (transposed, zero-padded)
    # b2_ref:  (1, tile_v)      f32   padded vocab lanes hold -1e30
    # h_ref:   (tile_b, 128)    bf16  scratch: hidden activations (per batch tile)
    # m_ref:   (tile_b, 1)      f32   scratch: running max
    # l_ref:   (tile_b, 1)      f32   scratch: running sum of exp
    j = pl.program_id(1)

    # Once per batch tile: hidden layer + reset the online-logsumexp state.
    @pl.when(j == 0)
    def _():
        pre = jnp.dot(x_ref[...], w1_ref[...],
                      preferred_element_type=jnp.float32) + b1_ref[...]
        h_ref[...] = jnp.tanh(pre).astype(jnp.bfloat16)
        m_ref[...] = jnp.full_like(m_ref[...], NEG_BIG)
        l_ref[...] = jnp.zeros_like(l_ref[...])

    # Logits for this vocab tile (bf16 MXU inputs, f32 accumulation + f32 epilogue).
    # Padded vocab lanes come out ~ -1e30 and vanish under the stable logsumexp.
    logits = jnp.dot(h_ref[...], w2_ref[...],
                     preferred_element_type=jnp.float32) + b2_ref[...]

    # Pass 1: accumulate the online logsumexp over vocab tiles.
    @pl.when(j < nv)
    def _():
        m_prev = m_ref[...]
        m_new = jnp.maximum(m_prev, jnp.max(logits, axis=-1, keepdims=True))
        l_ref[...] = (l_ref[...] * jnp.exp(m_prev - m_new)
                      + jnp.sum(jnp.exp(logits - m_new), axis=-1, keepdims=True))
        m_ref[...] = m_new

    # Pass 2: recompute the tile (cheap, K=128) and emit both outputs exactly once.
    @pl.when(j >= nv)
    def _():
        logz = m_ref[...] + jnp.log(l_ref[...])
        logits_ref[...] = logits
        logp_ref[...] = logits - logz


def pad_params(params, vocab_size):
    """One-time lane-dense padding + bf16 cast of the weights.

    Call ONCE outside the per-step forward so the weight set is not re-read /
    re-written in HBM on every call (perf review item #1).
    """
    _, _, v_pad = _v_layout(vocab_size)
    w1_p = jnp.pad(params["w1"],
                   ((0, IN_PAD - IN_FEAT), (0, HID_PAD - HID))).astype(jnp.bfloat16)
    b1_p = jnp.pad(params["b1"], ((0, 0), (0, HID_PAD - HID)))                 # f32
    w2_p = jnp.pad(params["w2"],
                   ((0, HID_PAD - HID), (0, v_pad - vocab_size))).astype(jnp.bfloat16)
    b2_p = jnp.pad(params["b2"], ((0, 0), (0, v_pad - vocab_size)),
                   constant_values=NEG_BIG)                                    # f32
    return {"embeddings": params["embeddings"],
            "w1_p": w1_p, "b1_p": b1_p, "w2_p": w2_p, "b2_p": b2_p}


@functools.partial(jax.jit, static_argnames=("vocab_size",))
def feed_forward(token_ids, padded_params, vocab_size):
    """token_ids: (B, 5) int32 -> (logits (B, V), log_probs (B, V))."""
    emb = padded_params["embeddings"]
    w1_p, b1_p = padded_params["w1_p"], padded_params["b1_p"]
    w2_p, b2_p = padded_params["w2_p"], padded_params["b2_p"]

    B = token_ids.shape[0]
    tile_v, nv, v_pad = _v_layout(vocab_size)
    tile_b, nb, b_pad = _b_layout(B, tile_v)

    # Glue (plain JAX): embedding gather + flatten -> (B, 500); pad + bf16-cast in one pass.
    # TODO(synk): move this gather into the kernel (scalar-prefetch ids + VMEM gather).
    embeds = jnp.take(emb, token_ids, axis=0).reshape(B, IN_FEAT)
    x_p = jnp.pad(embeds, ((0, b_pad - B), (0, IN_PAD - IN_FEAT))).astype(jnp.bfloat16)

    # Explicit scoped-VMEM budget sized from the tiles (x2 for double buffering).
    vmem_bytes = (
        2 * tile_b * IN_PAD * 2                         # x tile (bf16)
        + 2 * (IN_PAD * HID_PAD * 2 + HID_PAD * 4)      # w1 (bf16) + b1 (f32)
        + 2 * (HID_PAD * tile_v * 2 + tile_v * 4)       # w2 / b2 tiles
        + 2 * 2 * tile_b * tile_v * 4                   # logits + log_probs tiles (f32)
        + tile_b * HID_PAD * 2 + 2 * tile_b * 4         # h / m / l scratch
    )
    vmem_limit = min(48 << 20, max(32 << 20, int(1.5 * vmem_bytes)))

    grid = (nb, 2 * nv)   # batch tiles (parallel) x two passes over vocab tiles (arbitrary)

    logits_p, logp_p = pl.pallas_call(
        functools.partial(_ff_kernel, nv=nv),
        out_shape=(
            jax.ShapeDtypeStruct((b_pad, v_pad), jnp.float32),   # logits
            jax.ShapeDtypeStruct((b_pad, v_pad), jnp.float32),   # log_probs
        ),
        grid=grid,
        in_specs=[
            pl.BlockSpec((tile_b, IN_PAD), lambda i, j: (i, 0)),       # x: per batch tile
            pl.BlockSpec((IN_PAD, HID_PAD), lambda i, j: (0, 0)),      # w1: resident
            pl.BlockSpec((1, HID_PAD), lambda i, j: (0, 0)),           # b1: resident
            pl.BlockSpec((HID_PAD, tile_v), lambda i, j: (0, j % nv)),  # w2: streamed
            pl.BlockSpec((1, tile_v), lambda i, j: (0, j % nv)),        # b2: streamed
        ],
        out_specs=(
            # Stay on block 0 during pass 1 (never written there -> no garbage writeback),
            # then advance one vocab tile per pass-2 step: each block written exactly once.
            pl.BlockSpec((tile_b, tile_v), lambda i, j: (i, jnp.maximum(j - nv, 0))),
            pl.BlockSpec((tile_b, tile_v), lambda i, j: (i, jnp.maximum(j - nv, 0))),
        ),
        scratch_shapes=[
            pltpu.VMEM((tile_b, HID_PAD), jnp.bfloat16),   # h (bf16 for 2nd matmul)
            pltpu.VMEM((tile_b, 1), jnp.float32),          # running max
            pltpu.VMEM((tile_b, 1), jnp.float32),          # running sum-exp
        ],
        compiler_params=pltpu.CompilerParams(
            dimension_semantics=("parallel", "arbitrary"),
            vmem_limit_bytes=vmem_limit,
        ),
    )(x_p, w1_p, b1_p, w2_p, b2_p)

    logits = logits_p[:B, :vocab_size]
    log_probs = logp_p[:B, :vocab_size]
    return logits, log_probs


def init_params(key, vocab_size):
    k_emb, k_w1, k_b1, k_w2, k_b2 = jax.random.split(key, 5)

    # nn.Embedding weight ~ U(-0.1, 0.1) per the module's __init__.
    emb = jax.random.uniform(k_emb, (vocab_size, EMB_DIM), jnp.float32, -0.1, 0.1)

    # nn.Linear default init: U(-1/sqrt(fan_in), 1/sqrt(fan_in)); stored transposed.
    lim1 = 1.0 / jnp.sqrt(jnp.float32(IN_FEAT))
    w1 = jax.random.uniform(k_w1, (IN_FEAT, HID), jnp.float32, -lim1, lim1)
    b1 = jax.random.uniform(k_b1, (1, HID), jnp.float32, -lim1, lim1)

    lim2 = 1.0 / jnp.sqrt(jnp.float32(HID))
    w2 = jax.random.uniform(k_w2, (HID, vocab_size), jnp.float32, -lim2, lim2)
    b2 = jax.random.uniform(k_b2, (1, vocab_size), jnp.float32, -lim2, lim2)

    return {"embeddings": emb, "w1": w1, "b1": b1, "w2": w2, "b2": b2}


if __name__ == "__main__":
    key = jax.random.PRNGKey(0)
    vocab_size = 250   # exercises vocab padding 250 -> 256
    batch = 16
    context = CONTEXT  # view(-1, 5*100) implies 5 tokens per example

    k_params, k_ids = jax.random.split(key)
    params = init_params(k_params, vocab_size)
    token_ids = jax.random.randint(k_ids, (batch, context), 0, vocab_size, jnp.int32)

    # One-time weight padding / bf16 cast (outside the per-call forward path).
    padded_params = pad_params(params, vocab_size)
    padded_params = jax.block_until_ready(padded_params)

    logits, log_probs = feed_forward(token_ids, padded_params, vocab_size)
    jax.block_until_ready((logits, log_probs))

    # Sanity check against pure-JAX f32 reference (bf16 matmul inputs -> ~1e-3 abs error).
    embeds = jnp.take(params["embeddings"], token_ids, axis=0).reshape(batch, IN_FEAT)
    h_ref = jnp.tanh(embeds @ params["w1"] + params["b1"])
    logits_ref = h_ref @ params["w2"] + params["b2"]
    logp_ref = jax.nn.log_softmax(logits_ref, axis=-1)

    assert logits.shape == (batch, vocab_size)
    assert log_probs.shape == (batch, vocab_size)
    assert jnp.allclose(logits, logits_ref, atol=1e-2, rtol=1e-2)
    assert jnp.allclose(log_probs, logp_ref, atol=1e-2, rtol=1e-2)
    # log_softmax self-consistency: rows must normalize.
    assert jnp.allclose(jnp.exp(log_probs).sum(-1), 1.0, atol=1e-3)

    print("KERNEL_OK")
</pallas_src>

<mosaic_0001>
module attributes {stable_mosaic.version = 11 : i64} {
  func.func @_ff_kernel(%arg0: i32, %arg1: i32, %arg2: memref<16x512xbf16, #tpu.memory_space<vmem>>, %arg3: memref<512x128xbf16, #tpu.memory_space<vmem>>, %arg4: memref<1x128xf32, #tpu.memory_space<vmem>>, %arg5: memref<128x256xbf16, #tpu.memory_space<vmem>>, %arg6: memref<1x256xf32, #tpu.memory_space<vmem>>, %arg7: memref<16x256xf32, #tpu.memory_space<vmem>>, %arg8: memref<16x256xf32, #tpu.memory_space<vmem>>, %arg9: memref<16x128xbf16, #tpu.memory_space<vmem>>, %arg10: memref<16x1xf32, #tpu.memory_space<vmem>>, %arg11: memref<16x1xf32, #tpu.memory_space<vmem>>) attributes {dimension_semantics = [#tpu.dimension_semantics<parallel>, #tpu.dimension_semantics<arbitrary>], iteration_bounds = array<i64: 1, 2>, scalar_prefetch = 0 : i64, scratch_operands = 3 : i64, tpu.core_type = #tpu.core_type<tc>, window_params = [{transform_indices = @transform_0, window_bounds = array<i64: 16, 512>}, {pipeline_mode = #tpu.pipeline_mode<synchronous>, transform_indices = @transform_1, window_bounds = array<i64: 512, 128>}, {pipeline_mode = #tpu.pipeline_mode<synchronous>, transform_indices = @transform_2, window_bounds = array<i64: 1, 128>}, {transform_indices = @transform_3, window_bounds = array<i64: 128, 256>}, {transform_indices = @transform_4, window_bounds = array<i64: 1, 256>}, {transform_indices = @transform_5, window_bounds = array<i64: 16, 256>}, {transform_indices = @transform_6, window_bounds = array<i64: 16, 256>}]} {
    %c0_i32 = arith.constant 0 : i32
    %0 = arith.cmpi eq, %arg1, %c0_i32 : i32
    %1 = arith.extui %0 : i1 to i32
    %c0_i32_0 = arith.constant 0 : i32
    %2 = arith.cmpi ne, %1, %c0_i32_0 : i32
    scf.if %2 {
      %c0_9 = arith.constant 0 : index
      %c0_10 = arith.constant 0 : index
      %15 = vector.load %arg2[%c0_9, %c0_10] : memref<16x512xbf16, #tpu.memory_space<vmem>>, vector<16x512xbf16>
      %c0_11 = arith.constant 0 : index
      %c0_12 = arith.constant 0 : index
      %16 = vector.load %arg3[%c0_11, %c0_12] : memref<512x128xbf16, #tpu.memory_space<vmem>>, vector<512x128xbf16>
      %cst_13 = arith.constant dense<0.000000e+00> : vector<16x128xf32>
      %17 = tpu.matmul %15, %16, %cst_13 {dimension_numbers = #tpu.dot_dimension_numbers<[1], [0], [0], [1], [0, 0, 1, 1], [], []>} : vector<16x512xbf16>, vector<512x128xbf16>, vector<16x128xf32> -> vector<16x128xf32>
      %c0_14 = arith.constant 0 : index
      %c0_15 = arith.constant 0 : index
      %18 = vector.load %arg4[%c0_14, %c0_15] : memref<1x128xf32, #tpu.memory_space<vmem>>, vector<1x128xf32>
      %19 = vector.broadcast %18 : vector<1x128xf32> to vector<16x128xf32>
      %20 = arith.addf %17, %19 : vector<16x128xf32>
      %21 = math.tanh %20 : vector<16x128xf32>
      %22 = arith.truncf %21 : vector<16x128xf32> to vector<16x128xbf16>
      %c0_16 = arith.constant 0 : index
      %c0_17 = arith.constant 0 : index
      %23 = vector.load %arg9[%c0_16, %c0_17] : memref<16x128xbf16, #tpu.memory_space<vmem>>, vector<16x128xbf16>
      tpu.vector_store %arg9[%c0_16, %c0_17], %22 {strides = array<i32>} : memref<16x128xbf16, #tpu.memory_space<vmem>>, vector<16x128xbf16>,
      %cst_18 = arith.constant -1.000000e+30 : f32
      %24 = vector.broadcast %cst_18 : f32 to vector<16x1xf32>
      %c0_19 = arith.constant 0 : index
      %c0_20 = arith.constant 0 : index
      %25 = vector.load %arg10[%c0_19, %c0_20] : memref<16x1xf32, #tpu.memory_space<vmem>>, vector<16x1xf32>
      tpu.vector_store %arg10[%c0_19, %c0_20], %24 {strides = array<i32>} : memref<16x1xf32, #tpu.memory_space<vmem>>, vector<16x1xf32>,
      %cst_21 = arith.constant 0.000000e+00 : f32
      %26 = vector.broadcast %cst_21 : f32 to vector<16x1xf32>
      %c0_22 = arith.constant 0 : index
      %c0_23 = arith.constant 0 : index
      %27 = vector.load %arg11[%c0_22, %c0_23] : memref<16x1xf32, #tpu.memory_space<vmem>>, vector<16x1xf32>
      tpu.vector_store %arg11[%c0_22, %c0_23], %26 {strides = array<i32>} : memref<16x1xf32, #tpu.memory_space<vmem>>, vector<16x1xf32>,
    } else {
    }
    %c0 = arith.constant 0 : index
    %c0_1 = arith.constant 0 : index
    %3 = vector.load %arg9[%c0, %c0_1] : memref<16x128xbf16, #tpu.memory_space<vmem>>, vector<16x128xbf16>
    %c0_2 = arith.constant 0 : index
    %c0_3 = arith.constant 0 : index
    %4 = vector.load %arg5[%c0_2, %c0_3] : memref<128x256xbf16, #tpu.memory_space<vmem>>, vector<128x256xbf16>
    %cst = arith.constant dense<0.000000e+00> : vector<16x256xf32>
    %5 = tpu.matmul %3, %4, %cst {dimension_numbers = #tpu.dot_dimension_numbers<[1], [0], [0], [1], [0, 0, 1, 1], [], []>} : vector<16x128xbf16>, vector<128x256xbf16>, vector<16x256xf32> -> vector<16x256xf32>
    %c0_4 = arith.constant 0 : index
    %c0_5 = arith.constant 0 : index
    %6 = vector.load %arg6[%c0_4, %c0_5] : memref<1x256xf32, #tpu.memory_space<vmem>>, vector<1x256xf32>
    %7 = vector.broadcast %6 : vector<1x256xf32> to vector<16x256xf32>
    %8 = arith.addf %5, %7 : vector<16x256xf32>
    %c1_i32 = arith.constant 1 : i32
    %9 = arith.cmpi slt, %arg1, %c1_i32 : i32
    %10 = arith.extui %9 : i1 to i32
    %c0_i32_6 = arith.constant 0 : i32
    %11 = arith.cmpi ne, %10, %c0_i32_6 : i32
    scf.if %11 {
      %c0_9 = arith.constant 0 : index
      %c0_10 = arith.constant 0 : index
      %15 = vector.load %arg10[%c0_9, %c0_10] : memref<16x1xf32, #tpu.memory_space<vmem>>, vector<16x1xf32>
      %cst_11 = arith.constant dense<0xFF800000> : vector<16xf32>
      %16 = vector.multi_reduction <maximumf>, %8, %cst_11 [1] : vector<16x256xf32> to vector<16xf32>
      %17 = vector.shape_cast %16 : vector<16xf32> to vector<16x1xf32>
      %18 = arith.maximumf %15, %17 : vector<16x1xf32>
      %c0_12 = arith.constant 0 : index
      %c0_13 = arith.constant 0 : index
      %19 = vector.load %arg11[%c0_12, %c0_13] : memref<16x1xf32, #tpu.memory_space<vmem>>, vector<16x1xf32>
      %20 = arith.subf %15, %18 : vector<16x1xf32>
      %21 = math.exp %20 : vector<16x1xf32>
      %22 = arith.mulf %19, %21 : vector<16x1xf32>
      %23 = vector.broadcast %18 : vector<16x1xf32> to vector<16x256xf32>
      %24 = arith.subf %8, %23 : vector<16x256xf32>
      %25 = math.exp %24 : vector<16x256xf32>
      %cst_14 = arith.constant dense<0.000000e+00> : vector<16xf32>
      %26 = vector.multi_reduction <add>, %25, %cst_14 [1] : vector<16x256xf32> to vector<16xf32>
      %27 = vector.shape_cast %26 : vector<16xf32> to vector<16x1xf32>
      %28 = arith.addf %22, %27 : vector<16x1xf32>
      %c0_15 = arith.constant 0 : index
      %c0_16 = arith.constant 0 : index
      %29 = vector.load %arg11[%c0_15, %c0_16] : memref<16x1xf32, #tpu.memory_space<vmem>>, vector<16x1xf32>
      tpu.vector_store %arg11[%c0_15, %c0_16], %28 {strides = array<i32>} : memref<16x1xf32, #tpu.memory_space<vmem>>, vector<16x1xf32>,
      %c0_17 = arith.constant 0 : index
      %c0_18 = arith.constant 0 : index
      %30 = vector.load %arg10[%c0_17, %c0_18] : memref<16x1xf32, #tpu.memory_space<vmem>>, vector<16x1xf32>
      tpu.vector_store %arg10[%c0_17, %c0_18], %18 {strides = array<i32>} : memref<16x1xf32, #tpu.memory_space<vmem>>, vector<16x1xf32>,
    } else {
    }
    %c1_i32_7 = arith.constant 1 : i32
    %12 = arith.cmpi sge, %arg1, %c1_i32_7 : i32
    %13 = arith.extui %12 : i1 to i32
    %c0_i32_8 = arith.constant 0 : i32
    %14 = arith.cmpi ne, %13, %c0_i32_8 : i32
    scf.if %14 {
      %c0_9 = arith.constant 0 : index
      %c0_10 = arith.constant 0 : index
      %15 = vector.load %arg10[%c0_9, %c0_10] : memref<16x1xf32, #tpu.memory_space<vmem>>, vector<16x1xf32>
      %c0_11 = arith.constant 0 : index
      %c0_12 = arith.constant 0 : index
      %16 = vector.load %arg11[%c0_11, %c0_12] : memref<16x1xf32, #tpu.memory_space<vmem>>, vector<16x1xf32>
      %17 = math.log %16 : vector<16x1xf32>
      %18 = arith.addf %15, %17 : vector<16x1xf32>
      %c0_13 = arith.constant 0 : index
      %c0_14 = arith.constant 0 : index
      %19 = vector.load %arg7[%c0_13, %c0_14] : memref<16x256xf32, #tpu.memory_space<vmem>>, vector<16x256xf32>
      tpu.vector_store %arg7[%c0_13, %c0_14], %8 {strides = array<i32>} : memref<16x256xf32, #tpu.memory_space<vmem>>, vector<16x256xf32>,
      %20 = vector.broadcast %18 : vector<16x1xf32> to vector<16x256xf32>
      %21 = arith.subf %8, %20 : vector<16x256xf32>
      %c0_15 = arith.constant 0 : index
      %c0_16 = arith.constant 0 : index
      %22 = vector.load %arg8[%c0_15, %c0_16] : memref<16x256xf32, #tpu.memory_space<vmem>>, vector<16x256xf32>
      tpu.vector_store %arg8[%c0_15, %c0_16], %21 {strides = array<i32>} : memref<16x256xf32, #tpu.memory_space<vmem>>, vector<16x256xf32>,
    } else {
    }
    return
  }
  func.func @transform_0(%arg0: i32, %arg1: i32) -> (i32, i32) {
    %c0_i32 = arith.constant 0 : i32
    %c0_i32_0 = arith.constant 0 : i32
    return %arg0, %c0_i32 : i32, i32
  }
  func.func @transform_1(%arg0: i32, %arg1: i32) -> (i32, i32) {
    %c0_i32 = arith.constant 0 : i32
    %c0_i32_0 = arith.constant 0 : i32
    %c0_i32_1 = arith.constant 0 : i32
    return %c0_i32, %c0_i32_0 : i32, i32
  }
  func.func @transform_2(%arg0: i32, %arg1: i32) -> (i32, i32) {
    %c0_i32 = arith.constant 0 : i32
    %c0_i32_0 = arith.constant 0 : i32
    %c0_i32_1 = arith.constant 0 : i32
    return %c0_i32, %c0_i32_0 : i32, i32
  }
  func.func @transform_3(%arg0: i32, %arg1: i32) -> (i32, i32) {
    %c1_i32 = arith.constant 1 : i32
    %c0_i32 = arith.constant 0 : i32
    %0 = arith.cmpi eq, %c1_i32, %c0_i32 : i32
    %c1_i32_0 = arith.constant 1 : i32
    %1 = arith.select %0, %c1_i32_0, %c1_i32 : i32
    %2 = arith.remsi %arg1, %1 : i32
    %c0_i32_1 = arith.constant 0 : i32
    %3 = arith.cmpi ne, %2, %c0_i32_1 : i32
    %c0_i32_2 = arith.constant 0 : i32
    %4 = arith.cmpi slt, %2, %c0_i32_2 : i32
    %c0_i32_3 = arith.constant 0 : i32
    %5 = arith.cmpi slt, %1, %c0_i32_3 : i32
    %6 = arith.xori %4, %5 : i1
    %7 = arith.andi %6, %3 : i1
    %8 = arith.addi %2, %1 : i32
    %9 = arith.select %7, %8, %2 : i32
    %c0_i32_4 = arith.constant 0 : i32
    %c0_i32_5 = arith.constant 0 : i32
    return %c0_i32_4, %9 : i32, i32
  }
  func.func @transform_4(%arg0: i32, %arg1: i32) -> (i32, i32) {
    %c1_i32 = arith.constant 1 : i32
    %c0_i32 = arith.constant 0 : i32
    %0 = arith.cmpi eq, %c1_i32, %c0_i32 : i32
    %c1_i32_0 = arith.constant 1 : i32
    %1 = arith.select %0, %c1_i32_0, %c1_i32 : i32
    %2 = arith.remsi %arg1, %1 : i32
    %c0_i32_1 = arith.constant 0 : i32
    %3 = arith.cmpi ne, %2, %c0_i32_1 : i32
    %c0_i32_2 = arith.constant 0 : i32
    %4 = arith.cmpi slt, %2, %c0_i32_2 : i32
    %c0_i32_3 = arith.constant 0 : i32
    %5 = arith.cmpi slt, %1, %c0_i32_3 : i32
    %6 = arith.xori %4, %5 : i1
    %7 = arith.andi %6, %3 : i1
    %8 = arith.addi %2, %1 : i32
    %9 = arith.select %7, %8, %2 : i32
    %c0_i32_4 = arith.constant 0 : i32
    %c0_i32_5 = arith.constant 0 : i32
    return %c0_i32_4, %9 : i32, i32
  }
  func.func @transform_5(%arg0: i32, %arg1: i32) -> (i32, i32) {
    %c1_i32 = arith.constant 1 : i32
    %0 = arith.subi %arg1, %c1_i32 : i32
    %c0_i32 = arith.constant 0 : i32
    %1 = arith.maxsi %0, %c0_i32 : i32
    %c0_i32_0 = arith.constant 0 : i32
    return %arg0, %1 : i32, i32
  }
  func.func @transform_6(%arg0: i32, %arg1: i32) -> (i32, i32) {
    %c1_i32 = arith.constant 1 : i32
    %0 = arith.subi %arg1, %c1_i32 : i32
    %c0_i32 = arith.constant 0 : i32
    %1 = arith.maxsi %0, %c0_i32 : i32
    %c0_i32_0 = arith.constant 0 : i32
    return %arg0, %1 : i32, i32
  }
}

</mosaic_0001>

<bundles_post_ra>
// kernel: feed_forward.1
= control target key start
LH: loop header
LB: loop body
LE: loop exit
PB: predicated region body
PF: predicated region fallthrough
CT: control target
= control target key end

     0   :  { %12 = vsyncpa [#allocation6], 0  ;;  %s1863_s0 = inlined_call_operand.vmem [shape: bf16[16,512], index: 0, kind: input, shape index: {}]   ;;  %s1864_s1 = inlined_call_operand.vmem [shape: bf16[512,128], index: 1, kind: input, shape index: {}]   ;;  %s1865_s2 = inlined_call_operand.vmem [shape: f32[1,128], index: 2, kind: input, shape index: {}]   ;;  %s1866_s3 = inlined_call_operand.vmem [shape: bf16[128,256], index: 3, kind: input, shape index: {}]   ;;  %s1867_s4 = inlined_call_operand.vmem [shape: f32[1,256], index: 4, kind: input, shape index: {}]   ;;  %s1868_s5 = inlined_call_operand.hbm [shape: f32[16,256], index: 5, kind: output, shape index: {0}]   ;;  %s1869_s6 = inlined_call_operand.hbm [shape: f32[16,256], index: 6, kind: output, shape index: {1}]  }
   0x1   :  { %14 = vsyncpa [#allocation6 + $0x1], 0 }
   0x2   :  { %15 = vsyncpa [#allocation8], 0 }
   0x3   :  { %17 = vsyncpa [#allocation8 + $0x1], 0  ;;  %s1520_s21 = smov 0   ;;  %s1522_s22 = smov 0  }
   0x4   :  { %s1524_s23 = smov 0   ;;  %s1526_s24 = smov 0  }
   0x5   :  { %s1528_s25 = smov 0  }
   0x6 LB: > { %s1092_s26 = sadd.s32 4294967295, %s1474_s25   ;;  %s1093_s27 = sadd.s32 4294967294, %s1474_s25   ;;  %s1474_s25 = sphi %s1528_s25, %s23_s25   ;;  %s1470_s24 = sphi %s1526_s24, %s1874_s24   ;;  %s1466_s23 = sphi %s1524_s23, %s1873_s23   ;;  %s1462_s22 = sphi %s1522_s22, %s1853_s22   ;;  %s1458_s21 = sphi %s1520_s21, %s1872_s21  }
   0x7   : > { %s32_s28 = sadd.s32 1, %s1470_s24  ;;  %p1455_p1 = scmp.ne.s32.totalorder %s1462_s22, 0 }
   0x8   : > { %p33_p0 = scmp.ge.s32.totalorder %s32_s28, 2  ;;  %p171_p2 = scmp.eq.s32.totalorder %s1092_s26, 1 }
   0x9   : > { %p176_p3 = scmp.ne.s32.totalorder %s1462_s22, %s1458_s21  ;;  %p177_p5 = scmp.eq.s32.totalorder %s1093_s27, 1 }
   0xa   : > { %s1876_s28 = smov (%p33_p0, %s32_s28), 0  ;;  %p1553_p4 = por %p1455_p1, %p171_p2 }
   0xb   : > { %p1557_p6 = por %p177_p5, %p176_p3  ;;  %p1100_p7 = scmp.ge.s32.totalorder %s1474_s25, 1 }
   0xc   : > { %p251_p8 = scmp.lt.s32.totalorder %s1474_s25, 3 }
   0xe   : > { %p252_p9 = pnand %p1100_p7, %p251_p8 }
   0xf   : > { %s1564_s7 = sand.u32 (!%p252_p9), 1, %s1462_s22   ;;  %p1103_p10 = scmp.ne.s32.totalorder (!%p252_p9), %s1466_s23, 0 }
  0x10   : > { %255 = sbr.rel (%p252_p9) target bundleno = 1185 (0x4a1), region = 40  ;;  %s1101_s8 = sshll.u32 (!%p252_p9), %s1564_s7, 5 }
  0x11   : > { %s1567_s9 = scalar_lea.vmem (!%p252_p9), [#allocation5], %s1101_s8  ;;  %s1569_s10 = scalar_lea.vmem (!%p252_p9), [#allocation7], %s1101_s8 }
  0x17   : > { %308 = sbr.rel (%p1103_p10) target bundleno = 292 (0x124), region = 44  ;;  %v1282_v0 = vld [vmem:[%s1864_s1 + $0x40] sm:$0xff] (!%p1103_p10)   ;;  %v1286_v4 = vld [vmem:[%s1864_s1 + $0x48] sm:$0xff] (!%p1103_p10)   ;;  %v1290_v8 = vld [vmem:[%s1864_s1 + $0x50] sm:$0xff] (!%p1103_p10)   ;;  %vm682_vm0 = vcmask (!%p1103_p10), 7168   ;;  %v1477_v37 = vmov (!%p1103_p10), 0.0  }
  0x18   : > { %v1283_v1 = vld [vmem:[%s1864_s1 + $0xc0] sm:$0xff] (!%p1103_p10)   ;;  %1171 = vmatprep.subr.bf16.mxu0 (!%p1103_p10), %v1282_v0  ;;  %v1287_v5 = vld [vmem:[%s1864_s1 + $0xc8] sm:$0xff] (!%p1103_p10)   ;;  %v1291_v9 = vld [vmem:[%s1864_s1 + $0xd0] sm:$0xff] (!%p1103_p10)   ;;  %v1476_v36 = vmov (!%p1103_p10), -1e+30   ;;  %685 = vst.msk [vmem:[#allocation4] sm:$0xff] (!%p1103_p10), %vm682_vm0, %v1477_v37 }
  0x19   : > { %v1284_v2 = vld [vmem:[%s1864_s1] sm:$0xff] (!%p1103_p10)   ;;  %1193 = vmatprep.subr.bf16.mxu1 (!%p1103_p10), %v1283_v1  ;;  %v1288_v6 = vld [vmem:[%s1864_s1 + $0x8] sm:$0xff] (!%p1103_p10)   ;;  %v1292_v10 = vld [vmem:[%s1864_s1 + $0x10] sm:$0xff] (!%p1103_p10)   ;;  %683 = vst.msk [vmem:[#allocation3] sm:$0xff] (!%p1103_p10), %vm682_vm0, %v1476_v36 }
  0x1a   : > { %v1285_v3 = vld [vmem:[%s1864_s1 + $0x80] sm:$0xff] (!%p1103_p10)   ;;  %1172 = vmatpush3.bf16.msra.mxu0 (!%p1103_p10), %v1284_v2  ;;  %v1289_v7 = vld [vmem:[%s1864_s1 + $0x88] sm:$0xff] (!%p1103_p10)   ;;  %v1293_v11 = vld [vmem:[%s1864_s1 + $0x90] sm:$0xff] (!%p1103_p10)   ;;  %684 = vst.msk [vmem:[#allocation3 + $0x8] sm:$0xff] (!%p1103_p10), %vm682_vm0, %v1476_v36 }
  0x1b   : > { %1194 = vmatpush3.bf16.msra.mxu1 (!%p1103_p10), %v1285_v3  ;;  %1173 = vmatprep.subr.bf16.mxu0 (!%p1103_p10), %v1286_v4  ;;  %v1294_v12 = vld [vmem:[%s1864_s1 + $0x58] sm:$0xff] (!%p1103_p10)   ;;  %v1298_v16 = vld [vmem:[%s1864_s1 + $0x60] sm:$0xff] (!%p1103_p10)   ;;  %v1302_v20 = vld [vmem:[%s1864_s1 + $0x68] sm:$0xff] (!%p1103_p10)   ;;  %686 = vst.msk [vmem:[#allocation4 + $0x8] sm:$0xff] (!%p1103_p10), %vm682_vm0, %v1477_v37 }
  0x1c   : > { %1195 = vmatprep.subr.bf16.mxu1 (!%p1103_p10), %v1287_v5  ;;  %v1295_v13 = vld [vmem:[%s1864_s1 + $0xd8] sm:$0xff] (!%p1103_p10)   ;;  %v1299_v17 = vld [vmem:[%s1864_s1 + $0xe0] sm:$0xff] (!%p1103_p10)   ;;  %v1303_v21 = vld [vmem:[%s1864_s1 + $0xe8] sm:$0xff] (!%p1103_p10)  }
  0x1d   : > { %v1296_v14 = vld [vmem:[%s1864_s1 + $0x18] sm:$0xff] (!%p1103_p10)   ;;  %v1300_v18 = vld [vmem:[%s1864_s1 + $0x20] sm:$0xff] (!%p1103_p10)   ;;  %v1304_v22 = vld [vmem:[%s1864_s1 + $0x28] sm:$0xff] (!%p1103_p10)  }
  0x1e   : > { %1174 = vmatpush3.bf16.msra.mxu0 %v1288_v6  ;;  %v1297_v15 = vld [vmem:[%s1864_s1 + $0x98] sm:$0xff]   ;;  %v1301_v19 = vld [vmem:[%s1864_s1 + $0xa0] sm:$0xff]   ;;  %v1305_v23 = vld [vmem:[%s1864_s1 + $0xa8] sm:$0xff]  }
  0x1f   : > { %1196 = vmatpush3.bf16.msra.mxu1 %v1289_v7  ;;  %1175 = vmatprep.subr.bf16.mxu0 %v1290_v8  ;;  %v1306_v24 = vld [vmem:[%s1864_s1 + $0x70] sm:$0xff]   ;;  %v1310_v28 = vld [vmem:[%s1864_s1 + $0x78] sm:$0xff]   ;;  %v1104_v40 = vld [vmem:[%s1865_s2] ss:$0 sm:$0xff] }
  0x20   : > { %1197 = vmatprep.subr.bf16.mxu1 %v1291_v9  ;;  %v1307_v25 = vld [vmem:[%s1864_s1 + $0xf0] sm:$0xff]   ;;  %v1311_v29 = vld [vmem:[%s1864_s1 + $0xf8] sm:$0xff]  }
  0x21   : > { %v1308_v26 = vld [vmem:[%s1864_s1 + $0x30] sm:$0xff]   ;;  %v1312_v30 = vld [vmem:[%s1864_s1 + $0x38] sm:$0xff]  }
  0x22   : > { %1176 = vmatpush3.bf16.msra.mxu0 %v1292_v10  ;;  %v1309_v27 = vld [vmem:[%s1864_s1 + $0xb0] sm:$0xff]   ;;  %v1313_v31 = vld [vmem:[%s1864_s1 + $0xb8] sm:$0xff]  }
  0x23   : > { %1198 = vmatpush3.bf16.msra.mxu1 %v1293_v11  ;;  %1177 = vmatprep.subr.bf16.mxu0 %v1294_v12  ;;  %v1314_v32 = vld [vmem:[%s1863_s0] ss:$16 sps:$4 sm:$0xff]   ;;  %v1316_v33 = vld [vmem:[%s1863_s0 + $0x4] ss:$16 sps:$4 sm:$0xff]   ;;  %v1317_v34 = vld [vmem:[%s1863_s0 + $0x8] ss:$16 sps:$4 sm:$0xff]  }
  0x24   : > { %1199 = vmatprep.subr.bf16.mxu1 %v1295_v13  ;;  %v1319_v35 = vld [vmem:[%s1863_s0 + $0xc] ss:$16 sps:$4 sm:$0xff]   ;;  %628 = vmatprep.mubr.bf16.mxu0 %v1316_v33 }
  0x25   : > { %669 = vmatprep.mubr.bf16.mxu1 %v1319_v35 }
  0x26   : > { %1178 = vmatpush3.bf16.msra.mxu0 %v1296_v14 }
  0x27   : > { %1200 = vmatpush3.bf16.msra.mxu1 %v1297_v15  ;;  %1179 = vmatprep.subr.bf16.mxu0 %v1298_v16 }
  0x28   : > { %1201 = vmatprep.subr.bf16.mxu1 %v1299_v17 }
  0x2a   : > { %1180 = vmatpush3.bf16.msra.mxu0 %v1300_v18 }
  0x2b   : > { %1202 = vmatpush3.bf16.msra.mxu1 %v1301_v19  ;;  %1181 = vmatprep.subr.bf16.mxu0 %v1302_v20 }
  0x2c   : > { %1203 = vmatprep.subr.bf16.mxu1 %v1303_v21 }
  0x2e   : > { %1182 = vmatpush3.bf16.msra.mxu0 %v1304_v22 }
  0x2f   : > { %1204 = vmatpush3.bf16.msra.mxu1 %v1305_v23  ;;  %1183 = vmatprep.subr.bf16.mxu0 %v1306_v24 }
  0x30   : > { %1205 = vmatprep.subr.bf16.mxu1 %v1307_v25 }
  0x32   : > { %1184 = vmatpush3.bf16.msra.mxu0 %v1308_v26 }
  0x33   : > { %1206 = vmatpush3.bf16.msra.mxu1 %v1309_v27  ;;  %1185 = vmatprep.subr.bf16.mxu0 %v1310_v28 }
  0x34   : > { %1207 = vmatprep.subr.bf16.mxu1 %v1311_v29 }
  0x36   : > { %1186 = vmatpush3.bf16.msra.mxu0 %v1312_v30 }
  0x37   : > { %1208 = vmatpush3.bf16.msra.mxu1 %v1313_v31 }
  0x39   : > { %629 = vmatmul.mubr.bf16.vlgmr.msra.gmra.mrb[0].mxu0 %v1314_v32 }
  0x3a   : > { %670 = vmatmul.mubr.bf16.vlgmr.msra.gmra.mrb[0].mxu1 %v1317_v34 }
 0x10c   : > { %v1187_v38 = vpop.f32.mrb[0].mxu0 }
 0x10d   : > { %v1209_v39 = vpop.f32.mrb[0].mxu1  ;;  %v1188_v41 = vpop.f32.mrb[1].mxu0 }
 0x10e   : > { %v1189_v42 = vadd.f32 %v1188_v41, %v1187_v38  ;;  %v1210_v43 = vpop.f32.mrb[1].mxu1  ;;  %v1190_v44 = vpop.f32.mrb[2].mxu0 }
 0x10f   : > { %v1211_v45 = vadd.f32 %v1210_v43, %v1209_v39  ;;  %v1212_v46 = vpop.f32.mrb[2].mxu1  ;;  %v1191_v47 = vpop.f32.mrb[3].mxu0 }
 0x110   : > { %v631_v48 = vadd.f32 %v1189_v42, %v1104_v40  ;;  %v1192_v49 = vadd.f32 %v1191_v47, %v1190_v44  ;;  %v1213_v50 = vpop.f32.mrb[3].mxu1 }
 0x111   : > { %v1214_v51 = vadd.f32 %v1213_v50, %v1212_v46 }
 0x112   : > { %v672_v52 = vadd.f32 %v1211_v45, %v631_v48  ;;  %v634_v53 = vadd.f32 %v1192_v49, %v1104_v40 }
 0x114   : > { %v675_v54 = vadd.f32 %v1214_v51, %v634_v53  ;;  %1320 = vtanh.f32 %v672_v52 }
 0x116   : > { %1322 = vtanh.f32 %v675_v54 }
 0x11e   : > { %v1321_v55 = vpop.eup %1320 }
 0x120   : > { %v1323_v56 = vpop.eup %1322 }
 0x121   : > { %v680_v57 = vpack.c.bf16 %v1323_v56, %v1321_v55 }
 0x123   : > { %681 = vst [vmem:[#allocation2] sm:$0xff] %v680_v57 }
 0x124 PF: > { %v1324_v58 = vld [vmem:[%s1866_s3 + $0x4] ss:$8 sps:$4 sm:$0xff]   ;;  %v1326_v59 = vld [vmem:[%s1866_s3] ss:$8 sps:$4 sm:$0xff]   ;;  %v1478_v60 = vmov 0   ;;  %v706_v12 = vlaneseq  ;;  %p1157_p11 = scmp.ge.s32.totalorder %s1466_s23, 1 }
 0x125   : > { %828 = vmatprep.mubr.bf16.mxu0 %v1478_v60  ;;  %796 = vmatprep.subr.bf16.mxu0 %v1324_v58  ;;  %v1327_v61 = vld [vmem:[%s1866_s3 + $0x14] ss:$8 sps:$4 sm:$0xff]   ;;  %v1329_v62 = vld [vmem:[%s1866_s3 + $0x10] ss:$8 sps:$4 sm:$0xff]   ;;  %v1330_v63 = vld [vmem:[%s1866_s3 + $0x24] ss:$8 sps:$4 sm:$0xff]  }
 0x126   : > { %797 = vmatpush1.bf16.msra.mxu0 %v1326_v59  ;;  %v1332_v0 = vld [vmem:[%s1866_s3 + $0x20] ss:$8 sps:$4 sm:$0xff]   ;;  %v1333_v1 = vld [vmem:[%s1866_s3 + $0x34] ss:$8 sps:$4 sm:$0xff]   ;;  %v1335_v2 = vld [vmem:[%s1866_s3 + $0x30] ss:$8 sps:$4 sm:$0xff]  }
 0x127   : > { %798 = vmatprep.subr.bf16.mxu0 %v1327_v61  ;;  %v1336_v3 = vld [vmem:[%s1866_s3 + $0x44] ss:$8 sps:$4 sm:$0xff]   ;;  %v1338_v4 = vld [vmem:[%s1866_s3 + $0x40] ss:$8 sps:$4 sm:$0xff]   ;;  %v1339_v5 = vld [vmem:[%s1866_s3 + $0x54] ss:$8 sps:$4 sm:$0xff]  }
 0x128   : > { %v1341_v6 = vld [vmem:[%s1866_s3 + $0x50] ss:$8 sps:$4 sm:$0xff]   ;;  %v1342_v7 = vld [vmem:[%s1866_s3 + $0x64] ss:$8 sps:$4 sm:$0xff]   ;;  %v1344_v8 = vld [vmem:[%s1866_s3 + $0x60] ss:$8 sps:$4 sm:$0xff]  }
 0x129   : > { %v1345_v9 = vld [vmem:[%s1866_s3 + $0x74] ss:$8 sps:$4 sm:$0xff]   ;;  %v1347_v10 = vld [vmem:[%s1866_s3 + $0x70] ss:$8 sps:$4 sm:$0xff]   ;;  %v707_v13 = vshrl.u32 %v706_v12, 7  ;;  %v1479_v29 = vmov (!%p1157_p11), 0  }
 0x12a   : > { %799 = vmatpush1.bf16.msra.mxu0 %v1329_v62  ;;  %v687_v11 = vld [vmem:[#allocation2] sm:$0xff]  ;;  %1348 = vset.pattern.permute.xlu1 (!%p1157_p11), %v1479_v29  ;;  %v843_v30 = vld [vmem:[#allocation3] sm:$0xff] (!%p1157_p11)  ;;  %vm893_vm1 = vcmask (!%p1157_p11), 7168   ;;  %v844_v33 = vld [vmem:[#allocation3 + $0x8] sm:$0xff] (!%p1157_p11) }
 0x12b   : > { %800 = vmatprep.subr.bf16.mxu0 %v1330_v63  ;;  %v708_v14 = vsub.s32 0, %v707_v13  ;;  %v704_v15 = vld [vmem:[%s1867_s4] sm:$0x3]  ;;  %v712_v16 = vsub.s32 1, %v707_v13  ;;  %1349 = vset.pattern.permute.xlu0 (!%p1157_p11), %v1479_v29  ;;  %v853_v57 = vld [vmem:[#allocation4] sm:$0xff] (!%p1157_p11) }
 0x12c   : > { %v854_v61 = vld [vmem:[#allocation4 + $0x8] sm:$0xff] (!%p1157_p11) }
 0x12d   : > { %v709_v17 = vrot.slane %v704_v15, %v708_v14  ;;  %v713_v18 = vrot.slane %v704_v15, %v712_v16 }
 0x12e   : > { %801 = vmatpush1.bf16.msra.mxu0 %v1332_v0 }
 0x12f   : > { %802 = vmatprep.subr.bf16.mxu0 %v1333_v1 }
 0x132   : > { %803 = vmatpush1.bf16.msra.mxu0 %v1335_v2 }
 0x133   : > { %804 = vmatprep.subr.bf16.mxu0 %v1336_v3 }
 0x136   : > { %805 = vmatpush1.bf16.msra.mxu0 %v1338_v4 }
 0x137   : > { %806 = vmatprep.subr.bf16.mxu0 %v1339_v5 }
 0x13a   : > { %807 = vmatpush1.bf16.msra.mxu0 %v1341_v6 }
 0x13b   : > { %808 = vmatprep.subr.bf16.mxu0 %v1342_v7 }
 0x13e   : > { %809 = vmatpush1.bf16.msra.mxu0 %v1344_v8 }
 0x13f   : > { %810 = vmatprep.subr.bf16.mxu0 %v1345_v9 }
 0x142   : > { %811 = vmatpush1.bf16.msra.mxu0 %v1347_v10 }
 0x145   : > { %829 = vmatmul.mubr.bf16.vlgmr.msra.gmra.mrb[0].mxu0 %v687_v11 }
 0x216   : > { %842 = sbr.rel (%p1157_p11) target bundleno = 981 (0x3d5), region = 48 }
 0x218   : > { %v830_v19 = vpop.f32.mrb[0].mxu0 }
 0x219   : > { %v1734_v20 = vadd.f32 %v830_v19, %v709_v17  ;;  %v832_v21 = vpop.f32.mrb[1].mxu0 }
 0x21a   : > { %v1736_v22 = vadd.f32 %v832_v21, %v713_v18  ;;  %v834_v23 = vpop.f32.mrb[2].mxu0 }
 0x21b   : > { %v1738_v24 = vadd.f32 %v834_v23, %v709_v17  ;;  %v836_v25 = vpop.f32.mrb[3].mxu0 }
 0x21c   : > { %v1740_v26 = vadd.f32 %v836_v25, %v713_v18  ;;  %v845_v27 = vmax.f32 (!%p1157_p11), %v1734_v20, %v1736_v22 }
 0x21e   : > { %846 = vmax.xlane.f32.xlu0 %v845_v27  ;;  %v848_v28 = vmax.f32 %v1738_v24, %v1740_v26 }
 0x222   : > { %849 = vmax.xlane.f32.xlu0 %v848_v28 }
 0x2ab   : > { %v847_v31 = vpop.xlane.xlu0 %846 }
 0x2ac   : > { %v851_v32 = vmax.f32 %v843_v30, %v847_v31 }
 0x2ae   : > { %v855_v34 = vsub.f32 %v843_v30, %v851_v32  ;;  %896 = vst.msk [vmem:[#allocation3] sm:$0xff] %vm893_vm1, %v851_v32  ;;  %865 = vperm.xlu1 %1348, %v851_v32  }
 0x2af   : > { %v850_v35 = vpop.xlane.xlu0 %849 }
 0x2b0   : > { %v852_v36 = vmax.f32 %v844_v33, %v850_v35  ;;  %v857_v54 = vmul.f32 1.442695, %v855_v34 }
 0x2b2   : > { %v856_v37 = vsub.f32 %v844_v33, %v852_v36  ;;  %897 = vst.msk [vmem:[#allocation3 + $0x8] sm:$0xff] %vm893_vm1, %v852_v36  ;;  %870 = vperm.xlu1 %1348, %v852_v36  }
 0x2b4   : > { %v859_v55 = vmul.f32 1.442695, %v856_v37 }
 0x32d   : > { %v866_v38 = vpop.permute.xlu1 %865 }
 0x32e   : > { %v873_v39 = vsub.f32 %v1734_v20, %v866_v38  ;;  %v874_v40 = vsub.f32 %v1736_v22, %v866_v38 }
 0x330   : > { %v877_v41 = vmul.f32 1.442695, %v873_v39  ;;  %v879_v42 = vmul.f32 1.442695, %v874_v40 }
 0x331   : > { %v871_v43 = vpop.permute.xlu1 %870 }
 0x332   : > { %1350 = vpow2.f32 %v877_v41  ;;  %v875_v44 = vsub.f32 %v1738_v24, %v871_v43  ;;  %v876_v45 = vsub.f32 %v1740_v26, %v871_v43 }
 0x333   : > { %1352 = vpow2.f32 %v879_v42 }
 0x334   : > { %v881_v46 = vmul.f32 1.442695, %v875_v44  ;;  %v883_v47 = vmul.f32 1.442695, %v876_v45 }
 0x336   : > { %1354 = vpow2.f32 %v881_v46 }
 0x337   : > { %1356 = vpow2.f32 %v883_v47 }
 0x338   : > { %1358 = vpow2.f32 %v857_v54 }
 0x339   : > { %1360 = vpow2.f32 %v859_v55 }
 0x33c   : > { %v1351_v48 = vpop.eup %1350 }
 0x33d   : > { %v1353_v49 = vpop.eup %1352 }
 0x33e   : > { %v885_v50 = vadd.f32 %v1353_v49, %v1351_v48 }
 0x340   : > { %v1355_v51 = vpop.eup %1354  ;;  %886 = vadd.xlane.f32.xlu0 %v885_v50 }
 0x341   : > { %v1357_v52 = vpop.eup %1356 }
 0x342   : > { %v888_v53 = vadd.f32 %v1357_v52, %v1355_v51  ;;  %v1359_v56 = vpop.eup %1358 }
 0x343   : > { %v861_v58 = vmul.f32 %v1359_v56, %v853_v57  ;;  %v1361_v59 = vpop.eup %1360 }
 0x344   : > { %889 = vadd.xlane.f32.xlu1 %v888_v53  ;;  %v862_v63 = vmul.f32 %v1361_v59, %v854_v61 }
 0x3cd   : > { %v887_v60 = vpop.xlane.xlu0 %886 }
 0x3ce   : > { %v891_v62 = vadd.f32 %v887_v60, %v861_v58 }
 0x3d0   : > { %894 = vst.msk [vmem:[#allocation4] sm:$0xff] %vm893_vm1, %v891_v62 }
 0x3d1   : > { %v890_v0 = vpop.xlane.xlu1 %889 }
 0x3d2   : > { %v892_v1 = vadd.f32 %v890_v0, %v862_v63 }
 0x3d4   : > { %895 = vst.msk [vmem:[#allocation4 + $0x8] sm:$0xff] %vm893_vm1, %v892_v1 }
 0x3d5 PF: > { %p1158_p12 = scmp.lt.s32.totalorder %s1466_s23, 1 }
 0x3d6   : > { %912 = vst [vmem:[%s1567_s9] sm:$0xff] (!%p1158_p12), %v1734_v20  ;;  %913 = vst [vmem:[%s1567_s9 + $0x8] sm:$0xff] (!%p1158_p12), %v1736_v22  ;;  %v1480_v3 = vmov (!%p1158_p12), 0   ;;  %v902_v6 = vld [vmem:[#allocation3] sm:$0xff] (!%p1158_p12)  ;;  %v903_v9 = vld [vmem:[#allocation3 + $0x8] sm:$0xff] (!%p1158_p12) }
 0x3d7   : > { %901 = sbr.rel (%p1158_p12) target bundleno = 1134 (0x46e), region = 52  ;;  %v904_v2 = vld [vmem:[#allocation4] sm:$0xff] (!%p1158_p12)  ;;  %914 = vst [vmem:[%s1567_s9 + $0x10] sm:$0xff] (!%p1158_p12), %v1738_v24  ;;  %915 = vst [vmem:[%s1567_s9 + $0x18] sm:$0xff] (!%p1158_p12), %v1740_v26  ;;  %1362 = vset.pattern.permute.xlu0 (!%p1158_p12), %v1480_v3 }
 0x3d8   : > { %1363 = vlog2.f32 (!%p1158_p12), %v904_v2 }
 0x3db   : > { %v905_v4 = vld [vmem:[#allocation4 + $0x8] sm:$0xff] (!%p1158_p12) }
 0x3dc   : > { %1365 = vlog2.f32 (!%p1158_p12), %v905_v4 }
 0x3e2   : > { %v1364_v5 = vpop.eup %1363 }
 0x3e3   : > { %v907_v8 = vmul.f32 0.6931472, %v1364_v5 }
 0x3e5   : > { %v910_v11 = vadd.f32 %v907_v8, %v902_v6 }
 0x3e6   : > { %v1366_v7 = vpop.eup %1365 }
 0x3e7   : > { %v909_v10 = vmul.f32 0.6931472, %v1366_v7  ;;  %918 = vperm.xlu0 %1362, %v910_v11  }
 0x3e9   : > { %v911_v12 = vadd.f32 %v909_v10, %v903_v9 }
 0x3eb   : > { %923 = vperm.xlu0 %1362, %v911_v12  }
 0x466   : > { %v919_v13 = vpop.permute.xlu0 %918 }
 0x467   : > { %v926_v14 = vsub.f32 %v1734_v20, %v919_v13  ;;  %v927_v15 = vsub.f32 %v1736_v22, %v919_v13 }
 0x469   : > { %930 = vst [vmem:[%s1569_s10] sm:$0xff] %v926_v14  ;;  %931 = vst [vmem:[%s1569_s10 + $0x8] sm:$0xff] %v927_v15 }
 0x46a   : > { %v924_v16 = vpop.permute.xlu0 %923 }
 0x46b   : > { %v928_v17 = vsub.f32 %v1738_v24, %v924_v16  ;;  %v929_v18 = vsub.f32 %v1740_v26, %v924_v16 }
 0x46d   : > { %932 = vst [vmem:[%s1569_s10 + $0x10] sm:$0xff] %v928_v17  ;;  %933 = vst [vmem:[%s1569_s10 + $0x18] sm:$0xff] %v929_v18 }
 0x46e PF: > { %s1161_s15 = sadd.s32 4294967295, %s1466_s23  ;;  %s959_s16 = sshll.u32 %s1567_s9, 4  ;;  %s1774_s16 = int_to_ptr.vmem [resolvable:$true] %s959_s16 }
 0x46f   : > { %p948_p13 = scmp.gt.s32.totalorder %s1161_s15, 0  ;;  %s981_s18 = sshll.u32 %s1569_s10, 4  ;;  %s1816_s18 = int_to_ptr.vmem [resolvable:$true] %s981_s18 }
 0x470   : > { %s935_s23 = scalar_lea.sflag [#allocation6], %s1564_s7  ;;  %s1367_s9 = scalar_lea.vmem %s1774_s16, 512 }
 0x471   : > { %s1878_s15 = smov (!%p948_p13, %s1161_s15), 0  ;;  %p1368_p0 = scmp.ne.s32.totalorder %s1774_s16, %s1367_s9 }
 0x472   : > { %s1169_s17 = sshll.u32 %s1878_s15, 8  ;;  %s1481_s12 = smov [#allocation5]  }
 0x473   : > { %s1780_s26 = scalar_lea.hbm %s1868_s5, %s1169_s17  ;;  %s1785_s11 = scalar_lea.hbm %s1869_s6, %s1169_s17 }
 0x474   : > { %p1369_p1 = pnand %p1368_p0, %p1553_p4  ;;  %s1371_s13 = sshll.u32 %s1481_s12, 4  ;;  %s1372_s13 = int_to_ptr.vmem [resolvable:$false] %s1371_s13 }
 0x475   : > { %s1373_s14 = scalar_lea.vmem %s1372_s13, 1024  ;;  %p1374_p3 = scmp.lt.s32.totalorder %s1774_s16, %s1372_s13 }
 0x476   : > { %p1370_p2 = pneg %p1369_p1  ;;  %p1375_p5 = scmp.lt.s32.totalorder %s1373_s14, %s1367_s9 }
 0x478   : > { %p1376_p7 = por %p1375_p5, %p1374_p3 }
 0x47a   : > { %p1377_p8 = pnand %p1376_p7, %p1370_p2 }
 0x47c   : > { %1380 = shalt.err (!%p1377_p8)
}
 0x47d   : > { %s1381_s15 = scalar_lea.hbm %s1780_s26, 512  ;;  %s1385_s20 = scalar_lea.hbm %s1868_s5, 512 }
 0x47e   : > { %p1382_p9 = scmp.ne.s32.totalorder %s1780_s26, %s1381_s15  ;;  %p1386_p12 = scmp.lt.u32.totalorder %s1780_s26, %s1868_s5 }
 0x47f   : > { %p1387_p13 = scmp.lt.u32.totalorder %s1385_s20, %s1381_s15  ;;  %p1389_p1 = scmp.lt.u32.totalorder %s1381_s15, %s1780_s26 }
 0x480   : > { %p1383_p10 = pnand %p1382_p9, %p1553_p4 }
 0x481   : > { %p1388_p0 = por %p1387_p13, %p1386_p12 }
 0x482   : > { %p1384_p11 = pneg %p1383_p10 }
 0x483   : > { %p1390_p2 = por %p1389_p1, %p1388_p0 }
 0x485   : > { %p1391_p3 = pnand %p1390_p2, %p1384_p11 }
 0x487   : > { %1394 = shalt.err (!%p1391_p3)
}
 0x488   : > { %s1482_s9 = smov 256   ;;  %s1483_s12 = smov 16  }
 0x489   : > { %1215 = dma.vmem_to_hbm [thread:$0]  (%p1553_p4), %s1774_s16, 512, %s1780_s26, %s935_s23, %s1482_s9, %s1482_s9, %s1483_s12  }
 0x48a   : > { %s940_s13 = scalar_lea.sflag [#allocation8], %s1564_s7  ;;  %s1395_s14 = scalar_lea.vmem %s1816_s18, 512 }
 0x48b   : > { %p1396_p5 = scmp.ne.s32.totalorder %s1816_s18, %s1395_s14  ;;  %s1484_s15 = smov [#allocation7]  }
 0x48c   : > { %s1399_s17 = sshll.u32 %s1484_s15, 4  ;;  %s1400_s17 = int_to_ptr.vmem [resolvable:$false] %s1399_s17 }
 0x48d   : > { %p1397_p7 = pnand %p1396_p5, %p1553_p4  ;;  %s1401_s19 = scalar_lea.vmem %s1400_s17, 1024 }
 0x48e   : > { %p1402_p9 = scmp.lt.s32.totalorder %s1816_s18, %s1400_s17  ;;  %p1403_p10 = scmp.lt.s32.totalorder %s1401_s19, %s1395_s14 }
 0x48f   : > { %p1398_p8 = pneg %p1397_p7 }
 0x490   : > { %p1404_p11 = por %p1403_p10, %p1402_p9 }
 0x492   : > { %p1405_p12 = pnand %p1404_p11, %p1398_p8 }
 0x494   : > { %1408 = shalt.err (!%p1405_p12)
}
 0x495   : > { %s1409_s10 = scalar_lea.hbm %s1785_s11, 512  ;;  %s1413_s23 = scalar_lea.hbm %s1869_s6, 512 }
 0x496   : > { %p1410_p13 = scmp.ne.s32.totalorder %s1785_s11, %s1409_s10  ;;  %p1414_p2 = scmp.lt.u32.totalorder %s1785_s11, %s1869_s6 }
 0x497   : > { %p1415_p3 = scmp.lt.u32.totalorder %s1413_s23, %s1409_s10  ;;  %p1417_p7 = scmp.lt.u32.totalorder %s1409_s10, %s1785_s11 }
 0x498   : > { %p1411_p0 = pnand %p1410_p13, %p1553_p4 }
 0x499   : > { %p1416_p5 = por %p1415_p3, %p1414_p2 }
 0x49a   : > { %p1412_p1 = pneg %p1411_p0 }
 0x49b   : > { %p1418_p8 = por %p1417_p7, %p1416_p5 }
 0x49d   : > { %p1419_p9 = pnand %p1418_p8, %p1412_p1 }
 0x49f   : > { %1422 = shalt.err (!%p1419_p9)
}
 0x4a0   : > { %1216 = dma.vmem_to_hbm [thread:$0]  (%p1553_p4), %s1816_s18, 512, %s1785_s11, %s940_s13, %s1482_s9, %s1482_s9, %s1483_s12  }
 0x4a1 PF: > { %p1226_p10 = scmp.ge.s32.totalorder %s1474_s25, 2  ;;  %s996_s8 = sand.u32 1, %s1458_s21  }
 0x4a2   : > { %s997_s14 = scalar_lea.sflag [#allocation6], %s996_s8 }
 0x4a3   : > { %p1220_p11 = pnand %p1226_p10, %p1557_p6 }
 0x4a5   : > { %1448 = dma.done.wait (!%p1220_p11), %s997_s14, 512  }
 0x4a6   : > { %1450 = vsyncadd (!%p1220_p11), %s997_s14, 4294966784  ;;  %s1006_s29 = scalar_lea.sflag [#allocation8], %s996_s8 }
 0x4a7   : > { %1452 = dma.done.wait (!%p1220_p11), %s1006_s29, 512  }
 0x4a8   : > { %1454 = vsyncadd (!%p1220_p11), %s1006_s29, 4294966784  ;;  %s23_s25 = sadd.s32 1, %s1474_s25   ;;  %s1872_s21 = smov %s1462_s22 }
 0x4a9   : > { %p20_p12 = scmp.ge.s32.totalorder %s23_s25, 4   ;;  %s1853_s22 = smov 0  }
 0x4aa   : > { %s1873_s23 = smov %s1470_s24  ;;  %s1874_s24 = smov %s1876_s28 }
 0x4ab   :  { %22 = sbr.rel (!%p20_p12) target bundleno = 6 (0x6), region = 104 }
 0x4b2   :  { %1011 = vsyncpa [#allocation6], 1 }
 0x4b3   :  { %1013 = vsyncpa [#allocation6 + $0x1], 1 }
 0x4b4   :  { %1014 = vsyncpa [#allocation8], 1 }
 0x4b5   :  { %1016 = vsyncpa [#allocation8 + $0x1], 1 }

</bundles_post_ra>
